<compile_context>
chip_gen: v6e
topology: v6e:2x2x1
jax: 0.10.0
libtpu: 0.0.40
codegen_flags: <defaults>
</compile_context>

<pallas_src>
import jax
import jax.numpy as jnp
from jax.experimental import pallas as pl
from jax.experimental.pallas import tpu as pltpu


def _cross_attn_avg_kernel(tar_ref, src_ref, ori_ref, wqk_ref, wv_ref,
                           ctx_ref, attn_ref):
    R, H = ctx_ref.shape
    T = attn_ref.shape[1]

    # Projections: large-M MXU passes straight off the loaded 2-D tiles,
    # fp32 accumulation.  The key projection and 1/sqrt(H) are folded into Wqk.
    p = jnp.dot(src_ref[...], wqk_ref[...], preferred_element_type=jnp.float32)  # (R*T, H)
    v = jnp.dot(ori_ref[...], wv_ref[...], preferred_element_type=jnp.float32)   # (R*T, H)

    t2 = tar_ref[...].astype(jnp.float32)                                        # (R, H)
    p3 = p.reshape(R, T, H)
    v3 = v.reshape(R, T, H)

    # scores[r, t] = <p3[r,t,:], tar[r,:]>  (VPU multiply + lane reduce; no N=1 MXU pass)
    scores = jnp.sum(p3 * t2[:, None, :], axis=-1)                               # (R, T)

    # Softmax over T (torch softmax(dim=-2) on (B,S,T,1) == softmax over T).
    # Exact normalizer: attn is returned to the user, rows must sum to 1.
    m = jnp.max(scores, axis=-1, keepdims=True)
    e = jnp.exp(scores - m)
    attn = e * pl.reciprocal(jnp.sum(e, axis=-1, keepdims=True), approx=False)   # (R, T)

    # context[r, :] = sum_t attn[r, t] * v3[r, t, :]  (sublane reduce; no M=1 matmul)
    ctx = jnp.sum(attn[:, :, None] * v3, axis=1)                                 # (R, H)

    ctx_ref[...] = ctx.astype(ctx_ref.dtype)
    attn_ref[...] = attn.astype(attn_ref.dtype)


def _physical_vmem_bytes():
    """Per-core physical VMEM; conservative 64 MiB (v7x) fallback."""
    try:
        return int(pltpu.get_tpu_info().vmem_capacity_bytes)
    except Exception:
        return 64 << 20


def _choose_rows(bs, t, h, in_isz, out_isz, budget, row_mult, max_rows):
    """Rows per grid step.

    Budget covers double-buffered input/output blocks plus fp32 temporaries
    (q/v projections, broadcast products, scores/attn/ctx).  R is rounded to
    the dtype's sublane-packing multiple; the grid is kept >= 2 (and even when
    longer) so v7x's two TensorCores split the parallel axis evenly — the one
    extra step is noise on single-core v5e/v6e.
    """
    per_row = (2 * t * h + h) * in_isz * 2            # double-buffered tar/src/ori blocks
    per_row += (h + t) * out_isz * 2                  # double-buffered output blocks
    per_row += (5 * t * h + 2 * h + 4 * t) * 4        # fp32 temporaries
    r = budget // max(per_row, 1)
    r = max(row_mult, min(r, max_rows))
    r = (r // row_mult) * row_mult

    n = max(1, -(-bs // r))
    if n == 1 and bs > row_mult:
        n = 2
    elif n > 2 and (n % 2):
        n += 1
    r = -(-bs // n)
    r = max(row_mult, (-(-r // row_mult)) * row_mult)
    return r, n


def cross_attention_avg(tar, src, ori_src, wq, wk, wv, *,
                        compute_dtype=None, max_rows=4096):
    """tar: (B,S,H); src, ori_src: (B,S,T,H); wq/wk/wv: (H,H) torch Linear weights.

    compute_dtype: optional streaming dtype (e.g. jnp.bfloat16) for the inputs
    and weights; halves HBM traffic on this memory-bound kernel.  MXU
    accumulation stays fp32; outputs keep the caller's dtype.
    """
    B, S, T, H = src.shape
    BS = B * S
    out_dtype = src.dtype
    comp_dtype = jnp.dtype(compute_dtype) if compute_dtype is not None else jnp.dtype(src.dtype)
    in_isz = comp_dtype.itemsize
    out_isz = jnp.dtype(out_dtype).itemsize

    phys = _physical_vmem_bytes()
    weight_bytes = 2 * H * H * in_isz                        # Wqk + Wv^T, single copies
    block_budget = max(4 << 20, (phys * 2) // 5 - weight_bytes)
    row_mult = max(8, 32 // in_isz)                          # 8 fp32 / 16 bf16 / 32 int8-fp8
    R, n_steps = _choose_rows(BS, T, H, in_isz, out_isz, block_budget, row_mult, max_rows)
    BSp = R * n_steps
    vmem_limit = int(min(phys * 3 // 4, 96 << 20))           # explicit scoped-VMEM request

    # Pre-flatten to 2-D (free, row-major contiguous in HBM) so the loaded
    # tiles feed the MXU with no in-kernel relayout.
    tar_f = tar.reshape(BS, H).astype(comp_dtype)
    src_f = src.reshape(BS * T, H).astype(comp_dtype)
    ori_f = ori_src.reshape(BS * T, H).astype(comp_dtype)
    if BSp != BS:
        # Zero padding is safe: scores=0 -> uniform softmax (finite); sliced off below.
        pad = BSp - BS
        tar_f = jnp.pad(tar_f, ((0, pad), (0, 0)))
        src_f = jnp.pad(src_f, ((0, pad * T), (0, 0)))
        ori_f = jnp.pad(ori_f, ((0, pad * T), (0, 0)))

    # torch nn.Linear: y = x @ W^T.  Fuse the key projection and 1/sqrt(H):
    #   score = (src @ Wq^T) . (tar @ Wk^T) = (src @ (Wq^T @ Wk) / sqrt(H)) . tar
    inv_scale = 1.0 / (float(H) ** 0.5)
    wqk = (jnp.dot(wq.T.astype(jnp.float32), wk.astype(jnp.float32))
           * inv_scale).astype(comp_dtype)
    wvT = wv.T.astype(comp_dtype)

    ctx, attn = pl.pallas_call(
        _cross_attn_avg_kernel,
        out_shape=(
            jax.ShapeDtypeStruct((BSp, H), out_dtype),
            jax.ShapeDtypeStruct((BSp, T), out_dtype),
        ),
        grid_spec=pltpu.PrefetchScalarGridSpec(
            num_scalar_prefetch=0,
            grid=(n_steps,),
            in_specs=[
                pl.BlockSpec((R, H), lambda i: (i, 0)),              # tar rows
                pl.BlockSpec((R * T, H), lambda i: (i, 0)),          # src rows (pre-flattened)
                pl.BlockSpec((R * T, H), lambda i: (i, 0)),          # ori rows (pre-flattened)
                pl.BlockSpec(memory_space=pltpu.MemorySpace.VMEM),   # Wqk: single VMEM copy
                pl.BlockSpec(memory_space=pltpu.MemorySpace.VMEM),   # Wv^T: single VMEM copy
            ],
            out_specs=[
                pl.BlockSpec((R, H), lambda i: (i, 0)),              # context rows
                pl.BlockSpec((R, T), lambda i: (i, 0)),              # attn rows
            ],
        ),
        compiler_params=pltpu.CompilerParams(
            dimension_semantics=("parallel",),      # v7x megacore splits the row-tile axis
            vmem_limit_bytes=vmem_limit,
        ),
    )(tar_f, src_f, ori_f, wqk, wvT)

    ctx = ctx[:BS].reshape(B, S, H)
    attn = attn[:BS].reshape(B, S, T)
    return ctx, attn


def cross_attention_avg_ref(tar, src, ori_src, wq, wk, wv):
    """Pure-JAX reference mirroring the PyTorch forward."""
    H = src.shape[-1]
    q = jnp.einsum('bsth,oh->bsto', src, wq)
    k = jnp.einsum('bsh,oh->bso', tar, wk)
    v = jnp.einsum('bsth,oh->bsto', ori_src, wv)
    scores = jnp.einsum('bsth,bsh->bst', q, k) / (H ** 0.5)
    attn = jax.nn.softmax(scores, axis=-1)                  # softmax over T
    ctx = jnp.einsum('bst,bsth->bsh', attn, v)
    return ctx, attn


if __name__ == "__main__":
    # BS = 10 -> two grid steps of R = 8 rows: exercises padding and the
    # multi-step (v7x two-core) path.
    B, S, T, H = 2, 5, 8, 32
    key = jax.random.PRNGKey(0)
    k1, k2, k3, k4, k5, k6 = jax.random.split(key, 6)

    tar = jax.random.normal(k1, (B, S, H), dtype=jnp.float32)
    src = jax.random.normal(k2, (B, S, T, H), dtype=jnp.float32)
    ori_src = jax.random.normal(k3, (B, S, T, H), dtype=jnp.float32)

    # Deterministic synthetic Linear weights (shape (out, in) like torch).
    wq = jax.random.normal(k4, (H, H), dtype=jnp.float32) * (1.0 / H ** 0.5)
    wk = jax.random.normal(k5, (H, H), dtype=jnp.float32) * (1.0 / H ** 0.5)
    wv = jax.random.normal(k6, (H, H), dtype=jnp.float32) * (1.0 / H ** 0.5)

    ctx_ref, attn_ref = cross_attention_avg_ref(tar, src, ori_src, wq, wk, wv)

    # Full-precision path: tight parity with the PyTorch forward.
    ctx, attn = cross_attention_avg(tar, src, ori_src, wq, wk, wv)
    jax.block_until_ready((ctx, attn))
    assert ctx.shape == (B, S, H) and attn.shape == (B, S, T)
    assert jnp.allclose(ctx, ctx_ref, atol=2e-3, rtol=2e-3), \
        float(jnp.max(jnp.abs(ctx - ctx_ref)))
    assert jnp.allclose(attn, attn_ref, atol=2e-3, rtol=2e-3), \
        float(jnp.max(jnp.abs(attn - attn_ref)))

    # Reduced-precision streaming path (halves HBM bytes on this mem-bound
    # kernel); looser tolerance because inputs/weights are quantized to bf16.
    ctx_bf, attn_bf = cross_attention_avg(tar, src, ori_src, wq, wk, wv,
                                          compute_dtype=jnp.bfloat16)
    jax.block_until_ready((ctx_bf, attn_bf))
    assert jnp.allclose(ctx_bf, ctx_ref, atol=1e-1, rtol=1e-1)
    assert jnp.allclose(attn_bf, attn_ref, atol=1e-1, rtol=1e-1)

    print("KERNEL_OK")
</pallas_src>

<mosaic_0001>
module attributes {stable_mosaic.version = 11 : i64} {
  func.func @_cross_attn_avg_kernel(%arg0: i32, %arg1: memref<8x32xf32, #tpu.memory_space<vmem>>, %arg2: memref<64x32xf32, #tpu.memory_space<vmem>>, %arg3: memref<64x32xf32, #tpu.memory_space<vmem>>, %arg4: memref<32x32xf32, #tpu.memory_space<vmem>>, %arg5: memref<32x32xf32, #tpu.memory_space<vmem>>, %arg6: memref<8x32xf32, #tpu.memory_space<vmem>>, %arg7: memref<8x8xf32, #tpu.memory_space<vmem>>) attributes {dimension_semantics = [#tpu.dimension_semantics<parallel>], iteration_bounds = array<i64: 2>, scalar_prefetch = 0 : i64, scratch_operands = 0 : i64, tpu.core_type = #tpu.core_type<tc>, window_params = [{transform_indices = @transform_0, window_bounds = array<i64: 8, 32>}, {transform_indices = @transform_1, window_bounds = array<i64: 64, 32>}, {transform_indices = @transform_2, window_bounds = array<i64: 64, 32>}, {pipeline_mode = #tpu.pipeline_mode<synchronous>, transform_indices = @transform_3, window_bounds = array<i64: 32, 32>}, {pipeline_mode = #tpu.pipeline_mode<synchronous>, transform_indices = @transform_4, window_bounds = array<i64: 32, 32>}, {transform_indices = @transform_5, window_bounds = array<i64: 8, 32>}, {transform_indices = @transform_6, window_bounds = array<i64: 8, 8>}]} {
    %c0 = arith.constant 0 : index
    %c0_0 = arith.constant 0 : index
    %0 = vector.load %arg2[%c0, %c0_0] : memref<64x32xf32, #tpu.memory_space<vmem>>, vector<64x32xf32>
    %c0_1 = arith.constant 0 : index
    %c0_2 = arith.constant 0 : index
    %1 = vector.load %arg4[%c0_1, %c0_2] : memref<32x32xf32, #tpu.memory_space<vmem>>, vector<32x32xf32>
    %cst = arith.constant dense<0.000000e+00> : vector<64x32xf32>
    %2 = tpu.matmul %0, %1, %cst {dimension_numbers = #tpu.dot_dimension_numbers<[1], [0], [0], [1], [0, 0, 1, 1], [], []>} : vector<64x32xf32>, vector<32x32xf32>, vector<64x32xf32> -> vector<64x32xf32>
    %c0_3 = arith.constant 0 : index
    %c0_4 = arith.constant 0 : index
    %3 = vector.load %arg3[%c0_3, %c0_4] : memref<64x32xf32, #tpu.memory_space<vmem>>, vector<64x32xf32>
    %c0_5 = arith.constant 0 : index
    %c0_6 = arith.constant 0 : index
    %4 = vector.load %arg5[%c0_5, %c0_6] : memref<32x32xf32, #tpu.memory_space<vmem>>, vector<32x32xf32>
    %cst_7 = arith.constant dense<0.000000e+00> : vector<64x32xf32>
    %5 = tpu.matmul %3, %4, %cst_7 {dimension_numbers = #tpu.dot_dimension_numbers<[1], [0], [0], [1], [0, 0, 1, 1], [], []>} : vector<64x32xf32>, vector<32x32xf32>, vector<64x32xf32> -> vector<64x32xf32>
    %c0_8 = arith.constant 0 : index
    %c0_9 = arith.constant 0 : index
    %6 = vector.load %arg1[%c0_8, %c0_9] : memref<8x32xf32, #tpu.memory_space<vmem>>, vector<8x32xf32>
    %7 = vector.shape_cast %2 : vector<64x32xf32> to vector<8x8x32xf32>
    %8 = vector.shape_cast %5 : vector<64x32xf32> to vector<8x8x32xf32>
    %9 = vector.shape_cast %6 : vector<8x32xf32> to vector<8x1x32xf32>
    %10 = vector.broadcast %9 : vector<8x1x32xf32> to vector<8x8x32xf32>
    %11 = arith.mulf %7, %10 : vector<8x8x32xf32>
    %cst_10 = arith.constant dense<0.000000e+00> : vector<8x8xf32>
    %12 = vector.multi_reduction <add>, %11, %cst_10 [2] : vector<8x8x32xf32> to vector<8x8xf32>
    %cst_11 = arith.constant dense<0xFF800000> : vector<8xf32>
    %13 = vector.multi_reduction <maximumf>, %12, %cst_11 [1] : vector<8x8xf32> to vector<8xf32>
    %14 = vector.shape_cast %13 : vector<8xf32> to vector<8x1xf32>
    %15 = vector.broadcast %14 : vector<8x1xf32> to vector<8x8xf32>
    %16 = arith.subf %12, %15 : vector<8x8xf32>
    %17 = math.exp %16 : vector<8x8xf32>
    %cst_12 = arith.constant dense<0.000000e+00> : vector<8xf32>
    %18 = vector.multi_reduction <add>, %17, %cst_12 [1] : vector<8x8xf32> to vector<8xf32>
    %19 = vector.shape_cast %18 : vector<8xf32> to vector<8x1xf32>
    %20 = tpu.reciprocal %19 : vector<8x1xf32> -> vector<8x1xf32>
    %21 = vector.broadcast %20 : vector<8x1xf32> to vector<8x8xf32>
    %22 = arith.mulf %17, %21 : vector<8x8xf32>
    %23 = vector.shape_cast %22 : vector<8x8xf32> to vector<8x8x1xf32>
    %24 = vector.broadcast %23 : vector<8x8x1xf32> to vector<8x8x32xf32>
    %25 = arith.mulf %24, %8 : vector<8x8x32xf32>
    %cst_13 = arith.constant dense<0.000000e+00> : vector<8x32xf32>
    %26 = vector.multi_reduction <add>, %25, %cst_13 [1] : vector<8x8x32xf32> to vector<8x32xf32>
    %c0_14 = arith.constant 0 : index
    %c0_15 = arith.constant 0 : index
    %27 = vector.load %arg6[%c0_14, %c0_15] : memref<8x32xf32, #tpu.memory_space<vmem>>, vector<8x32xf32>
    tpu.vector_store %arg6[%c0_14, %c0_15], %26 {strides = array<i32>} : memref<8x32xf32, #tpu.memory_space<vmem>>, vector<8x32xf32>,
    %c0_16 = arith.constant 0 : index
    %c0_17 = arith.constant 0 : index
    %28 = vector.load %arg7[%c0_16, %c0_17] : memref<8x8xf32, #tpu.memory_space<vmem>>, vector<8x8xf32>
    tpu.vector_store %arg7[%c0_16, %c0_17], %22 {strides = array<i32>} : memref<8x8xf32, #tpu.memory_space<vmem>>, vector<8x8xf32>,
    return
  }
  func.func @transform_0(%arg0: i32) -> (i32, i32) {
    %c0_i32 = arith.constant 0 : i32
    %c0_i32_0 = arith.constant 0 : i32
    return %arg0, %c0_i32 : i32, i32
  }
  func.func @transform_1(%arg0: i32) -> (i32, i32) {
    %c0_i32 = arith.constant 0 : i32
    %c0_i32_0 = arith.constant 0 : i32
    return %arg0, %c0_i32 : i32, i32
  }
  func.func @transform_2(%arg0: i32) -> (i32, i32) {
    %c0_i32 = arith.constant 0 : i32
    %c0_i32_0 = arith.constant 0 : i32
    return %arg0, %c0_i32 : i32, i32
  }
  func.func @transform_3(%arg0: i32) -> (i32, i32) {
    %c0_i32 = arith.constant 0 : i32
    %c0_i32_0 = arith.constant 0 : i32
    %c0_i32_1 = arith.constant 0 : i32
    return %c0_i32, %c0_i32_0 : i32, i32
  }
  func.func @transform_4(%arg0: i32) -> (i32, i32) {
    %c0_i32 = arith.constant 0 : i32
    %c0_i32_0 = arith.constant 0 : i32
    %c0_i32_1 = arith.constant 0 : i32
    return %c0_i32, %c0_i32_0 : i32, i32
  }
  func.func @transform_5(%arg0: i32) -> (i32, i32) {
    %c0_i32 = arith.constant 0 : i32
    %c0_i32_0 = arith.constant 0 : i32
    return %arg0, %c0_i32 : i32, i32
  }
  func.func @transform_6(%arg0: i32) -> (i32, i32) {
    %c0_i32 = arith.constant 0 : i32
    %c0_i32_0 = arith.constant 0 : i32
    return %arg0, %c0_i32 : i32, i32
  }
}

</mosaic_0001>

<bundles_post_ra>
// kernel: tpu_custom_call.1
= control target key start
LH: loop header
LB: loop body
LE: loop exit
PB: predicated region body
PF: predicated region fallthrough
CT: control target
= control target key end

     0   :  { %12 = vsyncpa [#allocation3], 0  ;;  %s1825_s0 = inlined_call_operand.vmem [shape: f32[16,32], index: 0, kind: input, shape index: {}]   ;;  %s1826_s1 = inlined_call_operand.vmem [shape: f32[128,32], index: 1, kind: input, shape index: {}]   ;;  %s1827_s2 = inlined_call_operand.vmem [shape: f32[128,32], index: 2, kind: input, shape index: {}]   ;;  %s1828_s3 = inlined_call_operand.vmem [shape: f32[32,32], index: 3, kind: input, shape index: {}]   ;;  %s1829_s4 = inlined_call_operand.vmem [shape: f32[32,32], index: 4, kind: input, shape index: {}]   ;;  %s1830_s5 = inlined_call_operand.hbm [shape: f32[16,32], index: 5, kind: output, shape index: {0}]   ;;  %s1831_s6 = inlined_call_operand.vmem [shape: f32[16,8], index: 6, kind: output, shape index: {1}]  }
   0x1   :  { %14 = vsyncpa [#allocation3 + $0x1], 0  ;;  %s1506_s21 = smov 0   ;;  %s1508_s22 = smov 0  }
   0x2   :  { %s1510_s23 = smov 0   ;;  %s1512_s24 = smov 0  }
   0x3 LB: > { %s1527_s25 = sadd.s32 4294967295, %s1466_s24   ;;  %s1249_s26 = sadd.s32 4294967294, %s1466_s24   ;;  %s1466_s24 = sphi %s1512_s24, %s1837_s24   ;;  %s1462_s23 = sphi %s1510_s23, %s1836_s23   ;;  %s1458_s22 = sphi %s1508_s22, %s1835_s22   ;;  %s1454_s21 = sphi %s1506_s21, %s1834_s21  }
   0x4   : > { %s1531_s27 = sadd.s32 1, %s1466_s24   ;;  %s147_s28 = sadd.s32 1, %s1462_s23 }
   0x5   : > { %s144_s29 = ssub.s32 %s1466_s24, %s1531_s27  ;;  %p157_p0 = scmp.ne.s32.totalorder %s1462_s23, %s1458_s22 }
   0x6   : > { %p145_p1 = scmp.eq.s32.totalorder %s144_s29, 0  ;;  %p158_p2 = scmp.eq.s32.totalorder %s1527_s25, 1 }
   0x7   : > { %p163_p3 = scmp.ne.s32.totalorder %s1458_s22, %s1454_s21  ;;  %p164_p4 = scmp.eq.s32.totalorder %s1249_s26, 1 }
   0x8   : > { %s1542_s30 = scalar_select %p145_p1, %s1462_s23, %s147_s28  }
   0x9   : > { %p1544_p5 = por %p158_p2, %p157_p0  ;;  %p1548_p6 = por %p164_p4, %p163_p3 }
   0xa   : > { %p1252_p7 = scmp.ge.s32.totalorder %s1466_s24, 1  ;;  %p239_p8 = scmp.lt.s32.totalorder %s1466_s24, 3 }
   0xc   : > { %p240_p9 = pnand %p1252_p7, %p239_p8 }
   0xd   : > { %s1255_s13 = sshll.u32 (!%p240_p9), %s1527_s25, 3  ;;  %p282_p11 = scmp.lt.s32.totalorder (!%p240_p9), %s1527_s25, 1 }
   0xe   : > { %243 = sbr.rel (%p240_p9) target bundleno = 1029 (0x405), region = 40  ;;  %p287_p10 = scmp.lt.s32.totalorder (!%p240_p9), %s1255_s13, 15 }
   0xf   : > { %s273_s14 = sand.u32 (!%p240_p9), 1, %s1458_s22   ;;  %s1470_s9 = smov (!%p240_p9), [#allocation2]  }
  0x10   : > { %s1410_s10 = sshll.u32 (!%p240_p9), %s1470_s9, 4  ;;  %s1411_s10 = int_to_ptr.vmem [resolvable:$false] %s1410_s10 }
  0x13   : > { %v313_v0 = vld [vmem:[%s1828_s3 + $0x18] sm:$0xff]  ;;  %v312_v1 = vld [vmem:[%s1828_s3 + $0x10] sm:$0xff]  ;;  %v311_v2 = vld [vmem:[%s1828_s3 + $0x8] sm:$0xff]  ;;  %s1839_s13 = smov (!%p287_p10, %s1255_s13), 15  ;;  %vm314_vm0 = vcmask 261120   ;;  %v591_v14 = vlaneseq  ;;  %vm750_vm1 = vcmask 1041409  }
  0x14   : > { %1304 = vmatprep.subr.mxu0 %v313_v0  ;;  %v310_v3 = vld [vmem:[%s1828_s3] sm:$0xff]  ;;  %s1256_s18 = sshll.u32 %s1839_s13, 3  ;;  %v1468_v12 = vmov 1966171168   ;;  %vm752_vm2 = vcmask 1042434   ;;  %vm754_vm3 = vcmask 1043459  }
  0x15   : > { %1305 = vmatpush3.msra.mxu0 %v313_v0  ;;  %s290_s26 = scalar_lea.vmem %s1826_s1, %s1256_s18  ;;  %v589_v13 = vunpack.c.l.s4 %v1468_v12  ;;  %v1588_v16 = vshrl.u32 %v591_v14, 7  ;;  %vm756_vm4 = vcmask 1044484   ;;  %vm758_vm5 = vcmask 1045509   ;;  %s296_s20 = scalar_lea.vmem %s1827_s2, %s1256_s18 }
  0x16   : > { %1306 = vmatprep.subr.mxu0 %v312_v1  ;;  %v302_v4 = vld [vmem:[%s290_s26] sm:$0xff]  ;;  %v303_v5 = vld [vmem:[%s290_s26 + $0x8] sm:$0xff]  ;;  %v304_v6 = vld [vmem:[%s290_s26 + $0x10] sm:$0xff]  ;;  %s1585_s28 = scalar_select %p282_p11, %s1527_s25, 1  ;;  %vm760_vm6 = vcmask 1046534   ;;  %vm762_vm7 = vcmask 1047559  }
  0x17   : > { %1307 = vmatpush3.msra.mxu0 %v312_v1  ;;  %1312 = vmatprep.mubr.msk.f32.mxu0 %vm314_vm0, %v302_v4  ;;  %v305_v7 = vld [vmem:[%s290_s26 + $0x18] sm:$0xff]  ;;  %v306_v8 = vld [vmem:[%s290_s26 + $0x20] sm:$0xff]  ;;  %v307_v9 = vld [vmem:[%s290_s26 + $0x28] sm:$0xff]  ;;  %v590_v15 = vunpack.c.0.s8 %v589_v13  ;;  %v1597_v23 = vsub.s32 0, %v1588_v16  ;;  %v717_v1 = vand.u32 127, %v591_v14  ;;  %vm765_vm8 = vcmask 64512  }
  0x18   : > { %1308 = vmatprep.subr.mxu0 %v311_v2  ;;  %v308_v10 = vld [vmem:[%s290_s26 + $0x30] sm:$0xff]  ;;  %v309_v11 = vld [vmem:[%s290_s26 + $0x38] sm:$0xff]  ;;  %s1254_s29 = sshll.u32 %s1585_s28, 3  ;;  %s1253_s28 = sshll.u32 %s273_s14, 3 }
  0x19   : > { %1309 = vmatpush3.msra.mxu0 %v311_v2  ;;  %s285_s11 = scalar_lea.vmem %s1825_s0, %s1254_s29  ;;  %v593_v17 = vsub.s32 %v590_v15, %v1588_v16  ;;  %s301_s12 = scalar_lea.vmem %s1831_s6, %s1254_s29 }
  0x1a   : > { %1310 = vmatprep.subr.mxu0 %v310_v3  ;;  %v585_v18 = vld [vmem:[%s285_s11] sm:$0xff]  ;;  %s1277_s29 = sshll.u32 %s1527_s25, 7  ;;  %s275_s15 = scalar_lea.vmem [#allocation2], %s1253_s28 }
  0x1b   : > { %1311 = vmatpush3.msra.mxu0 %v310_v3  ;;  %v594_v19 = vrot.slane %v585_v18, %v593_v17  ;;  %v587_v21 = vcombine.high %v585_v18, %v585_v18  ;;  %v1616_v3 = vsub.s32 %v717_v1, %v1588_v16  ;;  %s1139_s16 = sshll.u32 %s275_s15, 4  ;;  %s1122_s25 = scalar_lea.sflag [#allocation3], %s273_s14  ;;  %s1140_s16 = int_to_ptr.vmem [resolvable:$true] %s1139_s16 }
  0x1c   : > { %1313 = vmatmul.mubr.msk.f32.vlgmr.msra.gmra.mxu0 %vm314_vm0, %v303_v5  ;;  %s1406_s26 = scalar_lea.vmem %s1140_s16, 128  ;;  %s1412_s11 = scalar_lea.vmem %s1411_s10, 256 }
  0x1d   : > { %1315 = vmatprep.mubr.msk.f32.mxu0 %vm314_vm0, %v304_v6  ;;  %v602_v20 = vcombine.high %v594_v19, %v594_v19  ;;  %v601_v24 = vrot.slane %v587_v21, %v593_v17  ;;  %v610_v25 = vrot.slane %v594_v19, %v593_v17  ;;  %p1407_p12 = scmp.ne.s32.totalorder %s1140_s16, %s1406_s26  ;;  %p1413_p1 = scmp.lt.s32.totalorder %s1140_s16, %s1411_s10 }
  0x1e   : > { %p1414_p2 = scmp.lt.s32.totalorder %s1412_s11, %s1406_s26 }
  0x1f   : > { %v624_v22 = vrot.slane %v602_v20, %v593_v17  ;;  %v603_v28 = vcombine.high %v601_v24, %v601_v24  ;;  %v639_v29 = vrot.slane %v610_v25, %v1597_v23  ;;  %v632_v30 = vcombine.high %v610_v25, %v610_v25  ;;  %p1408_p13 = pnand %p1407_p12, %p1544_p5 }
  0x20   : > { %1316 = vmatmul.mubr.msk.f32.gmra.mxu0 %vm314_vm0, %v305_v7  ;;  %v617_v36 = vrot.slane %v601_v24, %v593_v17  ;;  %p1415_p3 = por %p1414_p2, %p1413_p1 }
  0x21   : > { %1318 = vmatprep.mubr.msk.f32.mxu0 %vm314_vm0, %v306_v8  ;;  %v643_v26 = vrot.slane %v624_v22, %v1597_v23  ;;  %v634_v27 = vcombine.high %v624_v22, %v624_v22  ;;  %v631_v35 = vrot.slane %v603_v28, %v593_v17  ;;  %v647_v39 = vrot.slane %v632_v30, %v1597_v23  ;;  %p1409_p0 = pneg %p1408_p13 }
  0x22   : > { %v655_v44 = vrot.slane %v617_v36, %v1597_v23  ;;  %v633_v49 = vcombine.high %v617_v36, %v617_v36  ;;  %v776_v30 = vsub.s32 1, %v1588_v16 }
  0x23   : > { %v651_v33 = vrot.slane %v634_v27, %v1597_v23  ;;  %v659_v43 = vrot.slane %v631_v35, %v1597_v23  ;;  %v635_v45 = vcombine.high %v631_v35, %v631_v35  ;;  %p1416_p4 = pnand %p1415_p3, %p1409_p0 }
  0x24   : > { %1319 = vmatmul.mubr.msk.f32.gmra.mxu0 %vm314_vm0, %v307_v9  ;;  %v663_v56 = vrot.slane %v633_v49, %v1597_v23 }
  0x25   : > { %1321 = vmatprep.mubr.msk.f32.mxu0 %vm314_vm0, %v308_v10  ;;  %v667_v52 = vrot.slane %v635_v45, %v1597_v23 }
  0x28   : > { %1322 = vmatmul.mubr.msk.f32.gmra.mxu0 %vm314_vm0, %v309_v11 }
  0xdc   : > { %v1314_v31 = vpop.f32.mrf.mxu0 }
  0xdd   : > { %v677_v32 = vmul.f32 %v1314_v31, %v643_v26  ;;  %v780_v31 = vsub.s32 2, %v1588_v16 }
  0xde   : > { %v405_v34 = vpop.f32.mrf.mxu0 }
  0xdf   : > { %v676_v37 = vmul.f32 %v639_v29, %v405_v34  ;;  %v687_v38 = vsel %vm314_vm0, %v677_v32, 0.0  ;;  %v1469_v29 = vmov 0   ;;  %v784_v32 = vsub.s32 3, %v1588_v16 }
  0xe0   : > { %v1317_v40 = vpop.f32.mrf.mxu0  ;;  %688 = vadd.xlane.f32.xlu0 %v687_v38  ;;  %1385 = vset.pattern.permute.xlu1 %v1469_v29 }
  0xe1   : > { %v679_v41 = vmul.f32 %v1317_v40, %v651_v33  ;;  %v684_v47 = vsel %vm314_vm0, %v676_v37, 0.0  ;;  %1386 = vset.pattern.permute.xlu0 %v1469_v29  ;;  %v788_v37 = vsub.s32 4, %v1588_v16 }
  0xe2   : > { %v415_v42 = vpop.f32.mrf.mxu0 }
  0xe3   : > { %v678_v46 = vmul.f32 %v647_v39, %v415_v42  ;;  %v693_v48 = vsel %vm314_vm0, %v679_v41, 0.0 }
  0xe4   : > { %v1320_v50 = vpop.f32.mrf.mxu0  ;;  %685 = vadd.xlane.f32.xlu0 %v684_v47  ;;  %694 = vadd.xlane.f32.xlu1 %v693_v48  ;;  %v796_v48 = vsub.s32 6, %v1588_v16 }
  0xe5   : > { %v681_v53 = vmul.f32 %v1320_v50, %v659_v43  ;;  %v690_v55 = vsel %vm314_vm0, %v678_v46, 0.0 }
  0xe6   : > { %v425_v51 = vpop.f32.mrf.mxu0 }
  0xe7   : > { %v680_v54 = vmul.f32 %v655_v44, %v425_v51  ;;  %v699_v62 = vsel %vm314_vm0, %v681_v53, 0.0  ;;  %v792_v44 = vsub.s32 5, %v1588_v16 }
  0xe8   : > { %v1323_v57 = vpop.f32.mrf.mxu0  ;;  %691 = vadd.xlane.f32.xlu1 %v690_v55 }
  0xe9   : > { %v696_v58 = vsel %vm314_vm0, %v680_v54, 0.0  ;;  %v683_v60 = vmul.f32 %v1323_v57, %v667_v52  ;;  %v800_v52 = vsub.s32 7, %v1588_v16 }
  0xea   : > { %v435_v59 = vpop.f32.mrf.mxu0  ;;  %697 = vadd.xlane.f32.xlu0 %v696_v58 }
  0xeb   : > { %v682_v61 = vmul.f32 %v663_v56, %v435_v59  ;;  %v705_v0 = vsel %vm314_vm0, %v683_v60, 0.0 }
  0xec   : > { %700 = vadd.xlane.f32.xlu1 %v699_v62 }
  0xed   : > { %v702_v63 = vsel %vm314_vm0, %v682_v61, 0.0 }
  0xee   : > { %703 = vadd.xlane.f32.xlu0 %v702_v63 }
  0xf0   : > { %706 = vadd.xlane.f32.xlu1 %v705_v0 }
 0x169   : > { %v689_v2 = vpop.xlane.xlu0 %688 }
 0x16a   : > { %v725_v7 = vrot.slane %v689_v2, %v1616_v3 }
 0x16d   : > { %v686_v4 = vpop.xlane.xlu0 %685  ;;  %v695_v5 = vpop.xlane.xlu1 %694 }
 0x16e   : > { %v721_v6 = vrot.slane %v686_v4, %v1616_v3  ;;  %v733_v11 = vrot.slane %v695_v5, %v1616_v3 }
 0x170   : > { %v751_v10 = vsel %vm750_vm1, %v725_v7, %v721_v6  ;;  %v455_v7 = vld [vmem:[%s1829_s4 + $0x18] sm:$0xff] }
 0x171   : > { %v692_v8 = vpop.xlane.xlu1 %691  ;;  %1324 = vmatprep.subr.mxu1 %v455_v7 }
 0x172   : > { %v729_v9 = vrot.slane %v692_v8, %v1616_v3  ;;  %1325 = vmatpush3.msra.mxu1 %v455_v7 }
 0x173   : > { %v698_v12 = vpop.xlane.xlu0 %697 }
 0x174   : > { %v753_v13 = vsel %vm752_vm2, %v729_v9, %v751_v10  ;;  %v737_v14 = vrot.slane %v698_v12, %v1616_v3  ;;  %v444_v9 = vld [vmem:[%s296_s20] sm:$0xff]  ;;  %v453_v10 = vld [vmem:[%s1829_s4 + $0x8] sm:$0xff] }
 0x175   : > { %v755_v15 = vsel %vm754_vm3, %v733_v11, %v753_v13  ;;  %v701_v17 = vpop.xlane.xlu1 %700  ;;  %1332 = vmatprep.mubr.msk.f32.mxu1 %vm314_vm0, %v444_v9  ;;  %v452_v11 = vld [vmem:[%s1829_s4] sm:$0xff]  ;;  %v446_v13 = vld [vmem:[%s296_s20 + $0x10] sm:$0xff] }
 0x176   : > { %v757_v18 = vsel %vm756_vm4, %v737_v14, %v755_v15  ;;  %v741_v19 = vrot.slane %v701_v17, %v1616_v3  ;;  %v447_v14 = vld [vmem:[%s296_s20 + $0x18] sm:$0xff]  ;;  %v448_v15 = vld [vmem:[%s296_s20 + $0x20] sm:$0xff] }
 0x177   : > { %v704_v20 = vpop.xlane.xlu0 %703 }
 0x178   : > { %v745_v21 = vrot.slane %v704_v20, %v1616_v3  ;;  %v759_v22 = vsel %vm758_vm5, %v741_v19, %v757_v18  ;;  %v450_v18 = vld [vmem:[%s296_s20 + $0x30] sm:$0xff]  ;;  %v451_v19 = vld [vmem:[%s296_s20 + $0x38] sm:$0xff] }
 0x179   : > { %v707_v24 = vpop.xlane.xlu1 %706 }
 0x17a   : > { %v749_v25 = vrot.slane %v707_v24, %v1616_v3  ;;  %v761_v26 = vsel %vm760_vm6, %v745_v21, %v759_v22 }
 0x17c   : > { %v763_v27 = vsel %vm762_vm7, %v749_v25, %v761_v26 }
 0x17d   : > { %v766_v28 = vsel %vm765_vm8, %v763_v27, -inf }
 0x17e   : > { %767 = vmax.xlane.f32.xlu0 %v766_v28 }
 0x207   : > { %v768_v33 = vpop.xlane.xlu0 %767 }
 0x208   : > { %v773_v34 = vrot.slane %v768_v33, %v1597_v23  ;;  %v777_v35 = vrot.slane %v768_v33, %v776_v30  ;;  %v781_v36 = vrot.slane %v768_v33, %v780_v31  ;;  %v785_v38 = vrot.slane %v768_v33, %v784_v32 }
 0x209   : > { %v789_v45 = vrot.slane %v768_v33, %v788_v37  ;;  %v793_v49 = vrot.slane %v768_v33, %v792_v44  ;;  %v797_v53 = vrot.slane %v768_v33, %v796_v48  ;;  %v801_v56 = vrot.slane %v768_v33, %v800_v52 }
 0x20a   : > { %v810_v39 = vsub.f32 %v686_v4, %v773_v34  ;;  %v811_v40 = vsub.f32 %v689_v2, %v777_v35  ;;  %v812_v41 = vsub.f32 %v692_v8, %v781_v36  ;;  %v813_v46 = vsub.f32 %v695_v5, %v785_v38  ;;  %v454_v8 = vld [vmem:[%s1829_s4 + $0x10] sm:$0xff] }
 0x20b   : > { %v814_v50 = vsub.f32 %v698_v12, %v789_v45  ;;  %v815_v54 = vsub.f32 %v701_v17, %v793_v49  ;;  %v816_v57 = vsub.f32 %v704_v20, %v797_v53  ;;  %v817_v61 = vsub.f32 %v707_v24, %v801_v56  ;;  %1326 = vmatprep.subr.mxu1 %v454_v8  ;;  %v445_v12 = vld [vmem:[%s296_s20 + $0x8] sm:$0xff] }
 0x20c   : > { %v818_v42 = vmul.f32 1.442695, %v810_v39  ;;  %v820_v43 = vmul.f32 1.442695, %v811_v40  ;;  %v822_v47 = vmul.f32 1.442695, %v812_v41  ;;  %1327 = vmatpush3.msra.mxu1 %v454_v8 }
 0x20d   : > { %v824_v51 = vmul.f32 1.442695, %v813_v46  ;;  %v826_v55 = vmul.f32 1.442695, %v814_v50  ;;  %v828_v58 = vmul.f32 1.442695, %v815_v54  ;;  %1328 = vmatprep.subr.mxu1 %v453_v10 }
 0x20e   : > { %1388 = vpow2.f32 %v818_v42  ;;  %v830_v62 = vmul.f32 1.442695, %v816_v57  ;;  %v832_v0 = vmul.f32 1.442695, %v817_v61  ;;  %1329 = vmatpush3.msra.mxu1 %v453_v10  ;;  %v449_v17 = vld [vmem:[%s296_s20 + $0x28] sm:$0xff]  ;;  %s1786_s20 = scalar_lea.hbm %s1830_s5, %s1277_s29 }
 0x20f   : > { %1390 = vpow2.f32 %v820_v43  ;;  %1330 = vmatprep.subr.mxu1 %v452_v11 }
 0x210   : > { %1392 = vpow2.f32 %v822_v47  ;;  %1331 = vmatpush3.msra.mxu1 %v452_v11 }
 0x211   : > { %1394 = vpow2.f32 %v824_v51  ;;  %1333 = vmatmul.mubr.msk.f32.vlgmr.msra.gmra.mxu1 %vm314_vm0, %v445_v12 }
 0x212   : > { %1396 = vpow2.f32 %v826_v55  ;;  %1335 = vmatprep.mubr.msk.f32.mxu1 %vm314_vm0, %v446_v13 }
 0x213   : > { %1398 = vpow2.f32 %v828_v58 }
 0x214   : > { %1400 = vpow2.f32 %v830_v62 }
 0x215   : > { %1402 = vpow2.f32 %v832_v0  ;;  %1336 = vmatmul.mubr.msk.f32.gmra.mxu1 %vm314_vm0, %v447_v14 }
 0x216   : > { %1338 = vmatprep.mubr.msk.f32.mxu1 %vm314_vm0, %v448_v15 }
 0x219   : > { %1339 = vmatmul.mubr.msk.f32.gmra.mxu1 %vm314_vm0, %v449_v17 }
 0x21a   : > { %1341 = vmatprep.mubr.msk.f32.mxu1 %vm314_vm0, %v450_v18 }
 0x21b   : > { %v1656_v59 = vpop.eup %1388 }
 0x21c   : > { %v1658_v60 = vpop.eup %1390  ;;  %843 = vperm.xlu1 %1385, %v1656_v59  }
 0x21d   : > { %846 = vperm.xlu0 %1386, %v1658_v60   ;;  %v1662_v63 = vpop.eup %1392  ;;  %1342 = vmatmul.mubr.msk.f32.gmra.mxu1 %vm314_vm0, %v451_v19 }
 0x21e   : > { %v1665_v1 = vpop.eup %1394 }
 0x21f   : > { %v1668_v2 = vpop.eup %1396 }
 0x220   : > { %849 = vperm.xlu1 %1385, %v1662_v63   ;;  %v1671_v4 = vpop.eup %1398 }
 0x221   : > { %v1674_v5 = vpop.eup %1400 }
 0x222   : > { %v1677_v6 = vpop.eup %1402 }
 0x224   : > { %852 = vperm.xlu1 %1385, %v1665_v1  }
 0x228   : > { %855 = vperm.xlu1 %1385, %v1668_v2  }
 0x22c   : > { %858 = vperm.xlu1 %1385, %v1671_v4  }
 0x230   : > { %861 = vperm.xlu1 %1385, %v1674_v5  }
 0x234   : > { %864 = vperm.xlu1 %1385, %v1677_v6  }
 0x297   : > { %v844_v20 = vpop.permute.xlu1 %843 }
 0x298   : > { %v847_v25 = vpop.permute.xlu0 %846  ;;  %v869_v28 = vrot.slane %v844_v20, %v1616_v3 }
 0x299   : > { %v873_v27 = vrot.slane %v847_v25, %v1616_v3 }
 0x29b   : > { %v850_v21 = vpop.permute.xlu1 %849  ;;  %v898_v36 = vsel %vm750_vm1, %v873_v27, %v869_v28 }
 0x29c   : > { %v877_v29 = vrot.slane %v850_v21, %v1616_v3 }
 0x29e   : > { %v899_v39 = vsel %vm752_vm2, %v877_v29, %v898_v36 }
 0x29f   : > { %v853_v22 = vpop.permute.xlu1 %852 }
 0x2a0   : > { %v881_v33 = vrot.slane %v853_v22, %v1616_v3 }
 0x2a2   : > { %v900_v41 = vsel %vm754_vm3, %v881_v33, %v899_v39 }
 0x2a3   : > { %v856_v24 = vpop.permute.xlu1 %855 }
 0x2a4   : > { %v885_v34 = vrot.slane %v856_v24, %v1616_v3 }
 0x2a6   : > { %v901_v42 = vsel %vm756_vm4, %v885_v34, %v900_v41 }
 0x2a7   : > { %v859_v26 = vpop.permute.xlu1 %858 }
 0x2a8   : > { %v889_v38 = vrot.slane %v859_v26, %v1616_v3 }
 0x2aa   : > { %v902_v45 = vsel %vm758_vm5, %v889_v38, %v901_v42 }
 0x2ab   : > { %v862_v35 = vpop.permute.xlu1 %861 }
 0x2ac   : > { %v893_v40 = vrot.slane %v862_v35, %v1616_v3 }
 0x2ae   : > { %v903_v47 = vsel %vm760_vm6, %v893_v40, %v902_v45 }
 0x2af   : > { %v865_v43 = vpop.permute.xlu1 %864 }
 0x2b0   : > { %v897_v46 = vrot.slane %v865_v43, %v1616_v3 }
 0x2b2   : > { %v904_v49 = vsel %vm762_vm7, %v897_v46, %v903_v47 }
 0x2b3   : > { %v906_v50 = vsel %vm765_vm8, %v904_v49, 0.0 }
 0x2b4   : > { %907 = vadd.xlane.f32.xlu1 %v906_v50 }
 0x33d   : > { %v908_v51 = vpop.xlane.xlu1 %907 }
 0x33e   : > { %1404 = vrcp.f32 %v908_v51 }
 0x34b   : > { %v1405_v53 = vpop.eup %1404 }
 0x34c   : > { %v914_v54 = vrot.slane %v1405_v53, %v1597_v23  ;;  %v918_v56 = vrot.slane %v1405_v53, %v776_v30  ;;  %v922_v58 = vrot.slane %v1405_v53, %v780_v31  ;;  %v926_v62 = vrot.slane %v1405_v53, %v784_v32 }
 0x34d   : > { %v942_v0 = vrot.slane %v1405_v53, %v800_v52 }
 0x34e   : > { %v951_v55 = vmul.f32 %v1656_v59, %v914_v54  ;;  %v952_v57 = vmul.f32 %v1658_v60, %v918_v56  ;;  %v953_v61 = vmul.f32 %v1662_v63, %v922_v58  ;;  %v954_v23 = vmul.f32 %v1665_v1, %v926_v62  ;;  %v1334_v1 = vpop.f32.mrf.mxu1 }
 0x34f   : > { %v930_v59 = vrot.slane %v1405_v53, %v788_v37  ;;  %v934_v60 = vrot.slane %v1405_v53, %v792_v44  ;;  %v938_v63 = vrot.slane %v1405_v53, %v796_v48  ;;  %v958_v37 = vmul.f32 %v1677_v6, %v942_v0 }
 0x350   : > { %961 = vperm.xlu0 %1386, %v951_v55  }
 0x351   : > { %v955_v30 = vmul.f32 %v1668_v2, %v930_v59  ;;  %v956_v31 = vmul.f32 %v1671_v4, %v934_v60  ;;  %v957_v32 = vmul.f32 %v1674_v5, %v938_v63  ;;  %v546_v2 = vpop.f32.mrf.mxu1 }
 0x353   : > { %v1337_v44 = vpop.f32.mrf.mxu1 }
 0x354   : > { %966 = vperm.xlu0 %1386, %v952_v57  }
 0x355   : > { %v556_v9 = vpop.f32.mrf.mxu1 }
 0x357   : > { %v1340_v12 = vpop.f32.mrf.mxu1 }
 0x358   : > { %971 = vperm.xlu0 %1386, %v953_v61  }
 0x359   : > { %v566_v15 = vpop.f32.mrf.mxu1 }
 0x35b   : > { %v1343_v25 = vpop.f32.mrf.mxu1 }
 0x35c   : > { %976 = vperm.xlu0 %1386, %v954_v23  }
 0x35d   : > { %v576_v42 = vpop.f32.mrf.mxu1 }
 0x360   : > { %981 = vperm.xlu0 %1386, %v955_v30  }
 0x364   : > { %986 = vperm.xlu0 %1386, %v956_v31  }
 0x368   : > { %991 = vperm.xlu0 %1386, %v957_v32  }
 0x36c   : > { %996 = vperm.xlu0 %1386, %v958_v37  }
 0x3cb   : > { %v962_v7 = vpop.permute.xlu0 %961 }
 0x3cc   : > { %v999_v10 = vmul.f32 %v962_v7, %v546_v2  ;;  %v1083_v38 = vrot.slane %v962_v7, %v1616_v3 }
 0x3ce   : > { %v1007_v16 = vsel %vm314_vm0, %v999_v10, 0.0 }
 0x3cf   : > { %v967_v8 = vpop.permute.xlu0 %966  ;;  %v1008_v17 = vrot.slane %v1007_v16, 4 }
 0x3d0   : > { %v1000_v4 = vmul.f32 %v1334_v1, %v967_v8  ;;  %v1087_v35 = vrot.slane %v967_v8, %v1616_v3 }
 0x3d1   : > { %v1009_v26 = vadd.f32 %v1008_v17, %v1007_v16 }
 0x3d2   : > { %v1014_v5 = vsel %vm314_vm0, %v1000_v4, 0.0  ;;  %v1112_v54 = vsel %vm750_vm1, %v1087_v35, %v1083_v38 }
 0x3d3   : > { %v972_v11 = vpop.permute.xlu0 %971  ;;  %v1015_v14 = vrot.slane %v1014_v5, 4  ;;  %v1010_v43 = vrot.slane %v1009_v26, 2 }
 0x3d4   : > { %v1001_v48 = vmul.f32 %v972_v11, %v556_v9  ;;  %v1091_v40 = vrot.slane %v972_v11, %v1616_v3 }
 0x3d5   : > { %v1016_v24 = vadd.f32 %v1015_v14, %v1014_v5  ;;  %v1011_v59 = vadd.f32 %v1010_v43, %v1009_v26 }
 0x3d6   : > { %v1021_v52 = vsel %vm314_vm0, %v1001_v48, 0.0  ;;  %v1113_v61 = vsel %vm752_vm2, %v1091_v40, %v1112_v54 }
 0x3d7   : > { %v977_v13 = vpop.permute.xlu0 %976  ;;  %v1022_v18 = vrot.slane %v1021_v52, 4  ;;  %v1017_v39 = vrot.slane %v1016_v24, 2  ;;  %v1012_v16 = vrot.slane %v1011_v59, 1 }
 0x3d8   : > { %v1002_v6 = vmul.f32 %v1337_v44, %v977_v13  ;;  %v1095_v46 = vrot.slane %v977_v13, %v1616_v3 }
 0x3d9   : > { %v1023_v27 = vadd.f32 %v1022_v18, %v1021_v52  ;;  %v1018_v58 = vadd.f32 %v1017_v39, %v1016_v24 }
 0x3da   : > { %v1028_v19 = vsel %vm314_vm0, %v1002_v6, 0.0  ;;  %v1114_v60 = vsel %vm754_vm3, %v1095_v46, %v1113_v61 }
 0x3db   : > { %v1029_v20 = vrot.slane %v1028_v19, 4  ;;  %v982_v21 = vpop.permute.xlu0 %981  ;;  %v1024_v45 = vrot.slane %v1023_v27, 2  ;;  %v1019_v9 = vrot.slane %v1018_v58, 1 }
 0x3dc   : > { %v1003_v22 = vmul.f32 %v982_v21, %v566_v15  ;;  %v1099_v50 = vrot.slane %v982_v21, %v1616_v3 }
 0x3dd   : > { %v1030_v29 = vadd.f32 %v1029_v20, %v1028_v19  ;;  %v1025_v30 = vadd.f32 %v1024_v45, %v1023_v27  ;;  %v1013_v20 = vadd.f32 %v1012_v16, %v1011_v59 }
 0x3de   : > { %v1035_v28 = vsel %vm314_vm0, %v1003_v22, 0.0  ;;  %v1115_v32 = vsel %vm756_vm4, %v1099_v50, %v1114_v60 }
 0x3df   : > { %v1036_v33 = vrot.slane %v1035_v28, 4  ;;  %v987_v34 = vpop.permute.xlu0 %986  ;;  %v1031_v49 = vrot.slane %v1030_v29, 2  ;;  %v1026_v48 = vrot.slane %v1025_v30, 1 }
 0x3e0   : > { %v1004_v36 = vmul.f32 %v1340_v12, %v987_v34  ;;  %v1103_v56 = vrot.slane %v987_v34, %v1616_v3 }
 0x3e1   : > { %v1037_v41 = vadd.f32 %v1036_v33, %v1035_v28  ;;  %v1032_v63 = vadd.f32 %v1031_v49, %v1030_v29  ;;  %v1027_v19 = vadd.f32 %v1026_v48, %v1025_v30 }
 0x3e2   : > { %v1042_v47 = vsel %vm314_vm0, %v1004_v36, 0.0  ;;  %v1116_v7 = vsel %vm758_vm5, %v1103_v56, %v1115_v32 }
 0x3e3   : > { %v1043_v51 = vrot.slane %v1042_v47, 4  ;;  %v992_v53 = vpop.permute.xlu0 %991  ;;  %v1038_v55 = vrot.slane %v1037_v41, 2  ;;  %v1033_v52 = vrot.slane %v1032_v63, 1 }
 0x3e4   : > { %v1005_v57 = vmul.f32 %v992_v53, %v576_v42  ;;  %v1107_v23 = vrot.slane %v992_v53, %v1616_v3 }
 0x3e5   : > { %v1044_v62 = vadd.f32 %v1043_v51, %v1042_v47  ;;  %v1039_v2 = vadd.f32 %v1038_v55, %v1037_v41  ;;  %v1034_v21 = vadd.f32 %v1033_v52, %v1032_v63 }
 0x3e6   : > { %v1049_v31 = vsel %vm314_vm0, %v1005_v57, 0.0  ;;  %v1117_v11 = vsel %vm760_vm6, %v1107_v23, %v1116_v7 }
 0x3e7   : > { %v1045_v0 = vrot.slane %v1044_v62, 2  ;;  %v1050_v37 = vrot.slane %v1049_v31, 4  ;;  %v997_v1 = vpop.permute.xlu0 %996  ;;  %v1040_v14 = vrot.slane %v1039_v2, 1 }
 0x3e8   : > { %v1006_v44 = vmul.f32 %v1343_v25, %v997_v1  ;;  %v1111_v8 = vrot.slane %v997_v1, %v1616_v3  ;;  %v1020_v3 = vadd.f32 %v1019_v9, %v1018_v58 }
 0x3e9   : > { %v1046_v4 = vadd.f32 %v1045_v0, %v1044_v62  ;;  %v1051_v10 = vadd.f32 %v1050_v37, %v1049_v31  ;;  %v1041_v25 = vadd.f32 %v1040_v14, %v1039_v2 }
 0x3ea   : > { %v1056_v12 = vsel %vm314_vm0, %v1006_v44, 0.0  ;;  %v1118_v5 = vsel %vm762_vm7, %v1111_v8, %v1117_v11  ;;  %v1071_v26 = vsel %vm750_vm1, %v1020_v3, %v1013_v20 }
 0x3eb   : > { %v1052_v13 = vrot.slane %v1051_v10, 2  ;;  %v1057_v6 = vrot.slane %v1056_v12, 4  ;;  %1120 = vst.msk [vmem:[%s301_s12] sm:$0xff] %vm765_vm8, %v1118_v5  ;;  %v1047_v15 = vrot.slane %v1046_v4, 1  ;;  %v1072_v29 = vsel %vm752_vm2, %v1027_v19, %v1071_v26 }
 0x3ec   : > { %v1073_v34 = vsel %vm754_vm3, %v1034_v21, %v1072_v29 }
 0x3ed   : > { %v1053_v17 = vadd.f32 %v1052_v13, %v1051_v10  ;;  %v1058_v18 = vadd.f32 %v1057_v6, %v1056_v12  ;;  %v1048_v27 = vadd.f32 %v1047_v15, %v1046_v4  ;;  %v1074_v36 = vsel %vm756_vm4, %v1041_v25, %v1073_v34 }
 0x3ef   : > { %v1054_v22 = vrot.slane %v1053_v17, 1  ;;  %v1059_v24 = vrot.slane %v1058_v18, 2  ;;  %v1075_v39 = vsel %vm758_vm5, %v1048_v27, %v1074_v36 }
 0x3f1   : > { %v1060_v28 = vadd.f32 %v1059_v24, %v1058_v18  ;;  %v1055_v33 = vadd.f32 %v1054_v22, %v1053_v17 }
 0x3f3   : > { %v1061_v35 = vrot.slane %v1060_v28, 1  ;;  %v1076_v40 = vsel %vm760_vm6, %v1055_v33, %v1075_v39 }
 0x3f5   : > { %v1062_v38 = vadd.f32 %v1061_v35, %v1060_v28 }
 0x3f7   : > { %v1077_v41 = vsel %vm762_vm7, %v1062_v38, %v1076_v40 }
 0x3f8   : > { %1079 = vst.msk [vmem:[%s275_s15] sm:$0xff] %vm314_vm0, %v1077_v41 }
 0x3f9   : > { %1419 = shalt.err (!%p1416_p4)
}
 0x3fa   : > { %s1420_s13 = scalar_lea.hbm %s1786_s20, 128  ;;  %s1424_s14 = scalar_lea.hbm %s1830_s5, 256 }
 0x3fb   : > { %p1421_p7 = scmp.ne.s32.totalorder %s1786_s20, %s1420_s13  ;;  %p1425_p10 = scmp.lt.s32.totalorder %s1786_s20, %s1830_s5 }
 0x3fc   : > { %p1426_p11 = scmp.lt.s32.totalorder %s1424_s14, %s1420_s13 }
 0x3fd   : > { %p1422_p8 = pnand %p1421_p7, %p1544_p5 }
 0x3fe   : > { %p1427_p12 = por %p1426_p11, %p1425_p10 }
 0x3ff   : > { %p1423_p9 = pneg %p1422_p8 }
 0x401   : > { %p1428_p13 = pnand %p1427_p12, %p1423_p9 }
 0x403   : > { %1431 = shalt.err (!%p1428_p13)
}
 0x404   : > { %1344 = dma.vmem_to_hbm [thread:$0]  (%p1544_p5), %s1140_s16, 128, %s1786_s20, %s1122_s25  }
 0x405 PF: > { %p1350_p0 = scmp.ge.s32.totalorder %s1466_s24, 2  ;;  %s1154_s15 = sand.u32 1, %s1454_s21  }
 0x406   : > { %s1155_s17 = scalar_lea.sflag [#allocation3], %s1154_s15 }
 0x407   : > { %p1347_p1 = pnand %p1350_p0, %p1548_p6 }
 0x409   : > { %p1348_p2 = pneg %p1347_p1 }
 0x40b   : > { %1449 = dma.done.wait (%p1348_p2), %s1155_s17, 128  }
 0x40c   : > { %1451 = vsyncadd (%p1348_p2), %s1155_s17, 4294967168  ;;  %p17_p3 = scmp.ge.s32.totalorder %s1531_s27, 4   ;;  %s1834_s21 = smov %s1458_s22 }
 0x40d   : > { %s1835_s22 = smov %s1462_s23  ;;  %s1836_s23 = smov %s1542_s30 }
 0x40e   : > { %s1837_s24 = smov %s1531_s27  ;;  %19 = sbr.rel (!%p17_p3) target bundleno = 3 (0x3), region = 93 }
 0x413   :  { %1167 = vsyncpa [#allocation3], 1 }
 0x414   :  { %1169 = vsyncpa [#allocation3 + $0x1], 1 }

</bundles_post_ra>
